<compile_context>
chip_gen: v5e
topology: v5e:2x2
jax: 0.10.0
libtpu: 0.0.40
codegen_flags: <defaults>
</compile_context>

<pallas_src>
import functools

import jax
import jax.numpy as jnp
from jax import lax
from jax.experimental import pallas as pl
from jax.experimental.pallas import tpu as pltpu

K = 3  # both convs are 3x3, stride 1, VALID


def _rup(x, m):
    return (x + m - 1) // m * m


def _pad_axis(a, axis, new_size):
    pad = new_size - a.shape[axis]
    if pad == 0:
        return a
    cfg = [(0, 0)] * a.ndim
    cfg[axis] = (0, pad)
    return jnp.pad(a, cfg)


def _device_kind():
    try:
        return jax.devices()[0].device_kind.lower()
    except Exception:
        return ""


def block_kernel(x_ref, w1_ref, b1_ref, w2_ref, b2_ref, o_ref, *, W, M, L1):
    """Fused conv3x3 -> ReLU -> conv3x3 on a flattened-CHW tile.

    x_ref : (1, Cin_p, M + 2*halo) bf16  flat frame(s) + zero halo on lanes
    w1_ref: (Cmid_p, 9*Cin_p)      bf16  tap-major im2col weight matrix
    b1_ref: (Cmid_p, 1)            f32
    w2_ref: (Cout, 9*Cmid_p)       bf16
    b2_ref: (Cout, 1)              f32
    o_ref : (1, Cout, M)           full flat output (row stride W); wrapper crops
    """
    x = x_ref[0]                                           # (Cin_p, Mx) bf16

    # conv1: nine lane-shifted flat windows stacked on the sublane axis -> one
    # MXU dot with contraction 9*Cin_p.  Slices stay bf16 (no per-window cast).
    p1 = jnp.concatenate(
        [x[:, kh * W + kw: kh * W + kw + L1]
         for kh in range(K) for kw in range(K)],
        axis=0)                                            # (9*Cin_p, L1) bf16
    acc1 = jnp.dot(w1_ref[...], p1,
                   preferred_element_type=jnp.float32)     # (Cmid_p, L1) f32
    # Bias + ReLU epilogue in f32 (v5e-safe); fully lane-dense.
    h = jnp.maximum(acc1 + b1_ref[...], 0.0)               # (Cmid_p, L1) f32
    h_b = h.astype(jnp.bfloat16)                           # single cast

    # conv2: same windowing on the bf16 intermediate (row stride still W).
    p2 = jnp.concatenate(
        [h_b[:, kh * W + kw: kh * W + kw + M]
         for kh in range(K) for kw in range(K)],
        axis=0)                                            # (9*Cmid_p, M) bf16
    acc2 = jnp.dot(w2_ref[...], p2,
                   preferred_element_type=jnp.float32)     # (Cout, M) f32
    o_ref[0] = (acc2 + b2_ref[...]).astype(o_ref.dtype)


def block_forward(x_nchw, w1_oihw, b1, w2_oihw, b2, *,
                  images_per_step=None, out_dtype=None):
    """PyTorch-semantics Block forward: (N, Cin, H, W) -> (N, Cout, H-4, W-4)."""
    N, Cin, H, W = x_nchw.shape
    Cmid = w1_oihw.shape[0]
    Cout = w2_oihw.shape[0]
    H1, W1 = H - (K - 1), W - (K - 1)
    H2, W2 = H - 2 * (K - 1), W - 2 * (K - 1)
    HW = H * W
    out_dtype = x_nchw.dtype if out_dtype is None else out_dtype
    out_isize = jnp.dtype(out_dtype).itemsize

    # --- per-chip knobs -----------------------------------------------------
    kind = _device_kind()
    is_v7 = "v7" in kind
    # 16-sublane per-tap padding matches bf16 packing and the 256-deep MXU on
    # v6e/v7x; keep 8 on v5e (128-deep MXU) and older chips.
    pad_sub = 16 if ("v6" in kind or "v7" in kind) else 8
    cin_p = _rup(Cin, pad_sub)
    cmid_p = _rup(Cmid, pad_sub)
    vmem_phys = (64 if is_v7 else 128) * 1024 * 1024
    vmem_budget = int(vmem_phys * 0.72)          # ~46 MiB v7x, ~92 MiB v5e/v6e
    target_grid = 4 if is_v7 else 2              # steps for overlap / megacore

    halo = (K - 1) * (W + 1)                     # flat-lane halo per conv

    def vmem_estimate(nb):
        m = nb * HW
        mx = m + 2 * halo
        l1 = m + halo
        est = 2 * cin_p * mx * 2                 # double-buffered bf16 x tile
        est += 2 * Cout * m * out_isize          # double-buffered out tile
        est += 9 * cin_p * l1 * 2                # p1 (bf16)
        est += 9 * cmid_p * m * 2                # p2 (bf16)
        est += cmid_p * l1 * (4 + 4 + 2)         # acc1 + h (f32) + h_b (bf16)
        est += Cout * m * 4                      # acc2
        est += (cmid_p * 9 * cin_p + Cout * 9 * cmid_p) * 2   # weights
        est += (cmid_p + Cout) * 4                              # biases
        return est

    if images_per_step is None:
        feasible = [d for d in range(1, N + 1)
                    if N % d == 0 and vmem_estimate(d) <= vmem_budget]
        if not feasible:
            # TODO(synk): row-tile with a 4-row halo (instead of whole frames)
            # when even a single image exceeds the per-chip VMEM budget.
            images_per_step = 1
        else:
            deep = [d for d in feasible if N // d >= target_grid]
            images_per_step = max(deep) if deep else min(feasible)
    nb = images_per_step
    assert N % nb == 0, (N, nb)
    grid_n = N // nb
    M = nb * HW
    Mx = M + 2 * halo
    L1 = M + halo

    # ---- boundary layout prep (cheap XLA glue, not the hot path) ----
    # activations: NCHW -> (grid_n, Cin_p, nb*H*W + 2*halo), bf16, spatial
    # (+ folded batch) on lanes; trailing halo columns are zeros.
    xk = _pad_axis(x_nchw, 1, cin_p).reshape(grid_n, nb, cin_p, HW)
    xk = jnp.transpose(xk, (0, 2, 1, 3)).reshape(grid_n, cin_p, M)
    xk = _pad_axis(xk, 2, Mx).astype(jnp.bfloat16)

    # weights: OIHW -> tap-major (O, 9*I_padded) bf16 matrices; biases f32.
    w1m = _pad_axis(_pad_axis(jnp.transpose(w1_oihw, (0, 2, 3, 1)), 3, cin_p),
                    0, cmid_p)
    w1m = w1m.reshape(cmid_p, K * K * cin_p).astype(jnp.bfloat16)
    w2m = _pad_axis(jnp.transpose(w2_oihw, (0, 2, 3, 1)), 3, cmid_p)
    w2m = w2m.reshape(Cout, K * K * cmid_p).astype(jnp.bfloat16)
    b1k = _pad_axis(b1.reshape(Cmid, 1), 0, cmid_p).astype(jnp.float32)
    b2k = b2.reshape(Cout, 1).astype(jnp.float32)

    kernel = functools.partial(block_kernel, W=W, M=M, L1=L1)

    flops = 2 * N * K * K * (H1 * W1 * Cin * Cmid + H2 * W2 * Cmid * Cout)
    bytes_accessed = (grid_n * cin_p * Mx * 2
                      + cmid_p * K * K * cin_p * 2
                      + Cout * K * K * cmid_p * 2
                      + (cmid_p + Cout) * 4
                      + grid_n * Cout * M * out_isize)

    out_flat = pl.pallas_call(
        kernel,
        out_shape=jax.ShapeDtypeStruct((grid_n, Cout, M), out_dtype),
        grid_spec=pltpu.PrefetchScalarGridSpec(
            num_scalar_prefetch=0,
            grid=(grid_n,),
            in_specs=[
                pl.BlockSpec((1, cin_p, Mx), lambda g: (g, 0, 0)),
                pl.BlockSpec((cmid_p, K * K * cin_p), lambda g: (0, 0)),
                pl.BlockSpec((cmid_p, 1), lambda g: (0, 0)),
                pl.BlockSpec((Cout, K * K * cmid_p), lambda g: (0, 0)),
                pl.BlockSpec((Cout, 1), lambda g: (0, 0)),
            ],
            out_specs=pl.BlockSpec((1, Cout, M), lambda g: (g, 0, 0)),
        ),
        compiler_params=pltpu.CompilerParams(
            dimension_semantics=("parallel",),
            vmem_limit_bytes=vmem_budget),
        cost_estimate=pl.CostEstimate(
            flops=flops, transcendentals=0, bytes_accessed=bytes_accessed),
    )(xk, w1m, b1k, w2m, b2k)

    # Crop junk columns (flat row stride is W; valid window is H2 x W2) and
    # un-fold the batch.  No extra pad pass: the kernel already wrote M lanes.
    out = out_flat.reshape(grid_n, Cout, nb, H, W)[:, :, :, :H2, :W2]
    out = jnp.transpose(out, (0, 2, 1, 3, 4)).reshape(N, Cout, H2, W2)
    return out


def _reference(x_nchw, w1_oihw, b1, w2_oihw, b2):
    """Pure-JAX f32 reference with identical semantics."""
    dn = ("NCHW", "OIHW", "NCHW")
    h = lax.conv_general_dilated(x_nchw, w1_oihw, (1, 1), "VALID",
                                 dimension_numbers=dn)
    h = jnp.maximum(h + b1.reshape(1, -1, 1, 1), 0.0)
    o = lax.conv_general_dilated(h, w2_oihw, (1, 1), "VALID",
                                 dimension_numbers=dn)
    return o + b2.reshape(1, -1, 1, 1)


if __name__ == "__main__":
    # Small shapes consistent with Block(inChannels=4, outChannels=8)
    N, Cin, Cout, H, W = 2, 4, 8, 16, 16

    key = jax.random.PRNGKey(0)
    k_x, k_w1, k_b1, k_w2, k_b2 = jax.random.split(key, 5)

    x = jax.random.normal(k_x, (N, Cin, H, W), dtype=jnp.float32)
    # PyTorch Conv2d parameter shapes: OIHW weights, O bias.
    w1 = jax.random.normal(k_w1, (Cout, Cin, K, K), dtype=jnp.float32) * 0.1
    b1 = jax.random.normal(k_b1, (Cout,), dtype=jnp.float32) * 0.1
    w2 = jax.random.normal(k_w2, (Cout, Cout, K, K), dtype=jnp.float32) * 0.1
    b2 = jax.random.normal(k_b2, (Cout,), dtype=jnp.float32) * 0.1

    out = jax.block_until_ready(block_forward(x, w1, b1, w2, b2))
    ref = jax.block_until_ready(_reference(x, w1, b1, w2, b2))

    assert out.shape == (N, Cout, H - 4, W - 4), out.shape
    # Kernel uses bf16 MXU operands/activations with f32 accumulation, so
    # compare against the f32 reference with a bf16-appropriate tolerance.
    max_err = float(jnp.max(jnp.abs(out - ref)))
    assert jnp.allclose(out, ref, atol=5e-2, rtol=5e-2), max_err

    print("KERNEL_OK")
</pallas_src>

<mosaic_0001>
module attributes {stable_mosaic.version = 11 : i64} {
  func.func @block_kernel(%arg0: i32, %arg1: memref<1x8x324xbf16, #tpu.memory_space<vmem>>, %arg2: memref<8x72xbf16, #tpu.memory_space<vmem>>, %arg3: memref<8x1xf32, #tpu.memory_space<vmem>>, %arg4: memref<8x72xbf16, #tpu.memory_space<vmem>>, %arg5: memref<8x1xf32, #tpu.memory_space<vmem>>, %arg6: memref<1x8x256xf32, #tpu.memory_space<vmem>>) attributes {dimension_semantics = [#tpu.dimension_semantics<parallel>], iteration_bounds = array<i64: 2>, scalar_prefetch = 0 : i64, scratch_operands = 0 : i64, tpu.core_type = #tpu.core_type<tc>, window_params = [{transform_indices = @transform_0, window_bounds = array<i64: 1, 8, 324>}, {pipeline_mode = #tpu.pipeline_mode<synchronous>, transform_indices = @transform_1, window_bounds = array<i64: 8, 72>}, {pipeline_mode = #tpu.pipeline_mode<synchronous>, transform_indices = @transform_2, window_bounds = array<i64: 8, 1>}, {pipeline_mode = #tpu.pipeline_mode<synchronous>, transform_indices = @transform_3, window_bounds = array<i64: 8, 72>}, {pipeline_mode = #tpu.pipeline_mode<synchronous>, transform_indices = @transform_4, window_bounds = array<i64: 8, 1>}, {transform_indices = @transform_5, window_bounds = array<i64: 1, 8, 256>}]} {
    %c0 = arith.constant 0 : index
    %c0_0 = arith.constant 0 : index
    %c0_1 = arith.constant 0 : index
    %0 = vector.load %arg1[%c0, %c0_0, %c0_1] : memref<1x8x324xbf16, #tpu.memory_space<vmem>>, vector<1x8x324xbf16>
    %1 = vector.shape_cast %0 : vector<1x8x324xbf16> to vector<8x324xbf16>
    %2 = vector.extract_strided_slice %1 {offsets = [0, 0], sizes = [8, 290], strides = [1, 1]} : vector<8x324xbf16> to vector<8x290xbf16>
    %3 = vector.extract_strided_slice %1 {offsets = [0, 1], sizes = [8, 290], strides = [1, 1]} : vector<8x324xbf16> to vector<8x290xbf16>
    %4 = vector.extract_strided_slice %1 {offsets = [0, 2], sizes = [8, 290], strides = [1, 1]} : vector<8x324xbf16> to vector<8x290xbf16>
    %5 = vector.extract_strided_slice %1 {offsets = [0, 16], sizes = [8, 290], strides = [1, 1]} : vector<8x324xbf16> to vector<8x290xbf16>
    %6 = vector.extract_strided_slice %1 {offsets = [0, 17], sizes = [8, 290], strides = [1, 1]} : vector<8x324xbf16> to vector<8x290xbf16>
    %7 = vector.extract_strided_slice %1 {offsets = [0, 18], sizes = [8, 290], strides = [1, 1]} : vector<8x324xbf16> to vector<8x290xbf16>
    %8 = vector.extract_strided_slice %1 {offsets = [0, 32], sizes = [8, 290], strides = [1, 1]} : vector<8x324xbf16> to vector<8x290xbf16>
    %9 = vector.extract_strided_slice %1 {offsets = [0, 33], sizes = [8, 290], strides = [1, 1]} : vector<8x324xbf16> to vector<8x290xbf16>
    %10 = vector.extract_strided_slice %1 {offsets = [0, 34], sizes = [8, 290], strides = [1, 1]} : vector<8x324xbf16> to vector<8x290xbf16>
    %11 = tpu.concatenate %2, %3, %4, %5, %6, %7, %8, %9, %10 in 0 : vector<8x290xbf16>, vector<8x290xbf16>, vector<8x290xbf16>, vector<8x290xbf16>, vector<8x290xbf16>, vector<8x290xbf16>, vector<8x290xbf16>, vector<8x290xbf16>, vector<8x290xbf16> -> vector<72x290xbf16>
    %c0_2 = arith.constant 0 : index
    %c0_3 = arith.constant 0 : index
    %12 = vector.load %arg2[%c0_2, %c0_3] : memref<8x72xbf16, #tpu.memory_space<vmem>>, vector<8x72xbf16>
    %cst = arith.constant dense<0.000000e+00> : vector<8x290xf32>
    %13 = tpu.matmul %12, %11, %cst {dimension_numbers = #tpu.dot_dimension_numbers<[1], [0], [0], [1], [0, 0, 1, 1], [], []>} : vector<8x72xbf16>, vector<72x290xbf16>, vector<8x290xf32> -> vector<8x290xf32>
    %c0_4 = arith.constant 0 : index
    %c0_5 = arith.constant 0 : index
    %14 = vector.load %arg3[%c0_4, %c0_5] : memref<8x1xf32, #tpu.memory_space<vmem>>, vector<8x1xf32>
    %15 = vector.broadcast %14 : vector<8x1xf32> to vector<8x290xf32>
    %16 = arith.addf %13, %15 : vector<8x290xf32>
    %cst_6 = arith.constant 0.000000e+00 : f32
    %17 = vector.broadcast %cst_6 : f32 to vector<8x290xf32>
    %18 = arith.maximumf %16, %17 : vector<8x290xf32>
    %19 = arith.truncf %18 : vector<8x290xf32> to vector<8x290xbf16>
    %20 = vector.extract_strided_slice %19 {offsets = [0, 0], sizes = [8, 256], strides = [1, 1]} : vector<8x290xbf16> to vector<8x256xbf16>
    %21 = vector.extract_strided_slice %19 {offsets = [0, 1], sizes = [8, 256], strides = [1, 1]} : vector<8x290xbf16> to vector<8x256xbf16>
    %22 = vector.extract_strided_slice %19 {offsets = [0, 2], sizes = [8, 256], strides = [1, 1]} : vector<8x290xbf16> to vector<8x256xbf16>
    %23 = vector.extract_strided_slice %19 {offsets = [0, 16], sizes = [8, 256], strides = [1, 1]} : vector<8x290xbf16> to vector<8x256xbf16>
    %24 = vector.extract_strided_slice %19 {offsets = [0, 17], sizes = [8, 256], strides = [1, 1]} : vector<8x290xbf16> to vector<8x256xbf16>
    %25 = vector.extract_strided_slice %19 {offsets = [0, 18], sizes = [8, 256], strides = [1, 1]} : vector<8x290xbf16> to vector<8x256xbf16>
    %26 = vector.extract_strided_slice %19 {offsets = [0, 32], sizes = [8, 256], strides = [1, 1]} : vector<8x290xbf16> to vector<8x256xbf16>
    %27 = vector.extract_strided_slice %19 {offsets = [0, 33], sizes = [8, 256], strides = [1, 1]} : vector<8x290xbf16> to vector<8x256xbf16>
    %28 = vector.extract_strided_slice %19 {offsets = [0, 34], sizes = [8, 256], strides = [1, 1]} : vector<8x290xbf16> to vector<8x256xbf16>
    %29 = tpu.concatenate %20, %21, %22, %23, %24, %25, %26, %27, %28 in 0 : vector<8x256xbf16>, vector<8x256xbf16>, vector<8x256xbf16>, vector<8x256xbf16>, vector<8x256xbf16>, vector<8x256xbf16>, vector<8x256xbf16>, vector<8x256xbf16>, vector<8x256xbf16> -> vector<72x256xbf16>
    %c0_7 = arith.constant 0 : index
    %c0_8 = arith.constant 0 : index
    %30 = vector.load %arg4[%c0_7, %c0_8] : memref<8x72xbf16, #tpu.memory_space<vmem>>, vector<8x72xbf16>
    %cst_9 = arith.constant dense<0.000000e+00> : vector<8x256xf32>
    %31 = tpu.matmul %30, %29, %cst_9 {dimension_numbers = #tpu.dot_dimension_numbers<[1], [0], [0], [1], [0, 0, 1, 1], [], []>} : vector<8x72xbf16>, vector<72x256xbf16>, vector<8x256xf32> -> vector<8x256xf32>
    %c0_10 = arith.constant 0 : index
    %c0_11 = arith.constant 0 : index
    %32 = vector.load %arg5[%c0_10, %c0_11] : memref<8x1xf32, #tpu.memory_space<vmem>>, vector<8x1xf32>
    %33 = vector.broadcast %32 : vector<8x1xf32> to vector<8x256xf32>
    %34 = arith.addf %31, %33 : vector<8x256xf32>
    %c0_12 = arith.constant 0 : index
    %c0_13 = arith.constant 0 : index
    %c0_14 = arith.constant 0 : index
    %35 = vector.load %arg6[%c0_12, %c0_13, %c0_14] : memref<1x8x256xf32, #tpu.memory_space<vmem>>, vector<1x8x256xf32>
    %36 = vector.shape_cast %35 : vector<1x8x256xf32> to vector<8x256xf32>
    %37 = vector.shape_cast %34 : vector<8x256xf32> to vector<1x8x256xf32>
    tpu.vector_store %arg6[%c0_12, %c0_13, %c0_14], %37 {strides = array<i32>} : memref<1x8x256xf32, #tpu.memory_space<vmem>>, vector<1x8x256xf32>,
    return
  }
  func.func @transform_0(%arg0: i32) -> (i32, i32, i32) {
    %c0_i32 = arith.constant 0 : i32
    %c0_i32_0 = arith.constant 0 : i32
    %c0_i32_1 = arith.constant 0 : i32
    return %arg0, %c0_i32, %c0_i32_0 : i32, i32, i32
  }
  func.func @transform_1(%arg0: i32) -> (i32, i32) {
    %c0_i32 = arith.constant 0 : i32
    %c0_i32_0 = arith.constant 0 : i32
    %c0_i32_1 = arith.constant 0 : i32
    return %c0_i32, %c0_i32_0 : i32, i32
  }
  func.func @transform_2(%arg0: i32) -> (i32, i32) {
    %c0_i32 = arith.constant 0 : i32
    %c0_i32_0 = arith.constant 0 : i32
    %c0_i32_1 = arith.constant 0 : i32
    return %c0_i32, %c0_i32_0 : i32, i32
  }
  func.func @transform_3(%arg0: i32) -> (i32, i32) {
    %c0_i32 = arith.constant 0 : i32
    %c0_i32_0 = arith.constant 0 : i32
    %c0_i32_1 = arith.constant 0 : i32
    return %c0_i32, %c0_i32_0 : i32, i32
  }
  func.func @transform_4(%arg0: i32) -> (i32, i32) {
    %c0_i32 = arith.constant 0 : i32
    %c0_i32_0 = arith.constant 0 : i32
    %c0_i32_1 = arith.constant 0 : i32
    return %c0_i32, %c0_i32_0 : i32, i32
  }
  func.func @transform_5(%arg0: i32) -> (i32, i32, i32) {
    %c0_i32 = arith.constant 0 : i32
    %c0_i32_0 = arith.constant 0 : i32
    %c0_i32_1 = arith.constant 0 : i32
    return %arg0, %c0_i32, %c0_i32_0 : i32, i32, i32
  }
}

</mosaic_0001>

<bundles_post_ra>
// kernel: tpu_custom_call.1
= control target key start
LH: loop header
LB: loop body
LE: loop exit
PB: predicated region body
PF: predicated region fallthrough
CT: control target
= control target key end

     0   :  { %10 = vsyncpa [#allocation3], 0  ;;  %s1183_s0 = inlined_call_operand.hbm [shape: bf16[2,8,324], index: 0, kind: input, shape index: {}]   ;;  %s1184_s1 = inlined_call_operand.vmem [shape: bf16[8,72], index: 1, kind: input, shape index: {}]   ;;  %s1185_s2 = inlined_call_operand.vmem [shape: f32[8,1], index: 2, kind: input, shape index: {}]   ;;  %s1186_s3 = inlined_call_operand.vmem [shape: bf16[8,72], index: 3, kind: input, shape index: {}]   ;;  %s1187_s4 = inlined_call_operand.vmem [shape: f32[8,1], index: 4, kind: input, shape index: {}]   ;;  %s1188_s5 = inlined_call_operand.hbm [shape: f32[2,8,256], index: 5, kind: output, shape index: {}]  }
   0x1   :  { %12 = vsyncpa [#allocation3 + $0x1], 0 }
   0x2   :  { %13 = vsyncpa [#allocation4], 0 }
   0x3   :  { %15 = vsyncpa [#allocation4 + $0x1], 0  ;;  %s888_s18 = smov 0   ;;  %s890_s19 = smov 0  }
   0x4   :  { %s892_s20 = smov 0   ;;  %s894_s21 = smov 0  }
   0x5 LB: > { %s909_s22 = sadd.s32 4294967295, %s847_s21   ;;  %s674_s23 = sadd.s32 4294967294, %s847_s21   ;;  %s847_s21 = sphi %s894_s21, %s1196_s21   ;;  %s843_s20 = sphi %s892_s20, %s1195_s20   ;;  %s839_s19 = sphi %s890_s19, %s1194_s19   ;;  %s835_s18 = sphi %s888_s18, %s1193_s18  }
   0x6   : > { %s913_s24 = sadd.s32 1, %s847_s21   ;;  %s28_s25 = sadd.s32 1, %s843_s20 }
   0x7   : > { %s25_s26 = ssub.s32 %s847_s21, %s913_s24  ;;  %p35_p0 = scmp.ne.s32.totalorder %s843_s20, %s839_s19 }
   0x8   : > { %p26_p1 = scmp.eq.s32.totalorder %s25_s26, 0  ;;  %p36_p2 = scmp.eq.s32.totalorder %s847_s21, 0 }
   0x9   : > { %p41_p3 = scmp.ne.s32.totalorder %s839_s19, %s835_s18  ;;  %p42_p4 = scmp.eq.s32.totalorder %s909_s22, 0 }
   0xa   : > { %s925_s27 = scalar_select %p26_p1, %s843_s20, %s28_s25  }
   0xb   : > { %p37_p5 = por %p36_p2, %p35_p0  ;;  %p927_p6 = por %p42_p4, %p41_p3 }
   0xc   : > { %p149_p7 = scmp.eq.s32.totalorder %s909_s22, 1  ;;  %p155_p8 = scmp.eq.s32.totalorder %s674_s23, 1 }
   0xd   : > { %p676_p9 = scmp.ge.s32.totalorder %s847_s21, 2  ;;  %p706_p10 = scmp.lt.s32.totalorder %s847_s21, 2 }
   0xe   : > { %p934_p11 = por %p149_p7, %p35_p0  ;;  %p938_p12 = por %p155_p8, %p41_p3 }
   0xf   : > { %s187_s6 = sand.u32 1, %s843_s20   ;;  %s692_s7 = smul.u32 12, %s847_s21 }
  0x10   : > { %s691_s8 = smul.u32 12, %s187_s6  ;;  %p947_p13 = pnand %p706_p10, %p37_p5 }
  0x11   : > { %s196_s11 = scalar_lea.hbm %s1183_s0, %s692_s7  ;;  %s188_s16 = scalar_lea.sflag [#allocation3], %s187_s6 }
  0x12   : > { %s198_s13 = sshll.u32 %s196_s11, 4  ;;  %s191_s14 = scalar_lea.vmem [#allocation2], %s691_s8  ;;  %s199_s13 = int_to_ptr.hbm [resolvable:$true] %s198_s13 }
  0x13   : > { %s200_s15 = sshll.u32 %s191_s14, 4  ;;  %s751_s17 = sshra.s32 %s199_s13, 4  ;;  %s201_s15 = int_to_ptr.vmem [resolvable:$true] %s200_s15  ;;  %s752_s17 = int_to_ptr.hbm [resolvable:$true] %s751_s17 }
  0x14   : > { %s753_s23 = scalar_lea.hbm %s752_s17, 12  ;;  %p755_p1 = pneg %p947_p13 }
  0x15   : > { %p754_p0 = scmp.ne.s32.totalorder %s752_s17, %s753_s23  ;;  %s758_s7 = scalar_lea.hbm %s1183_s0, 24 }
  0x16   : > { %p759_p4 = scmp.lt.s32.totalorder %s752_s17, %s1183_s0  ;;  %p760_p5 = scmp.lt.s32.totalorder %s758_s7, %s753_s23 }
  0x17   : > { %p756_p2 = pnand %p755_p1, %p754_p0 }
  0x18   : > { %p761_p7 = por %p760_p5, %p759_p4 }
  0x19   : > { %p757_p3 = pneg %p756_p2 }
  0x1b   : > { %p762_p8 = pnand %p761_p7, %p757_p3 }
  0x1d   : > { %765 = shalt.err (!%p762_p8)
}
  0x1e   : > { %701 = dma.hbm_to_vmem [thread:$0]  (!%p947_p13), %s199_s13, 192, %s201_s15, %s188_s16  }
  0x1f   : > { %p678_p10 = scmp.ge.s32.totalorder %s847_s21, 1  ;;  %p205_p0 = scmp.lt.s32.totalorder %s847_s21, 3 }
  0x21   : > { %p206_p1 = pnand %p678_p10, %p205_p0 }
  0x22   : > { %s964_s6 = sand.u32 (!%p206_p1), 1, %s839_s19  }
  0x23   : > { %209 = sbr.rel (%p206_p1) target bundleno = 677 (0x2a5), region = 40  ;;  %s212_s11 = scalar_lea.sflag (!%p206_p1), [#allocation3], %s964_s6 }
  0x24   : > { %s693_s8 = smul.u32 (!%p206_p1), 12, %s964_s6 }
  0x26   : > { %s215_s14 = scalar_lea.vmem (!%p206_p1), [#allocation2], %s693_s8 }
  0x28   : > { %826 = dma.done.wait (%p927_p6), %s212_s11, 192  }
  0x29   : > { %828 = vsyncadd (%p927_p6), %s212_s11, 4294967104  ;;  %v245_v0 = vld [vmem:[%s215_s14 + $0x8] sm:$0xf]  ;;  %v244_v1 = vld [vmem:[%s215_s14] sm:$0xff]  ;;  %s849_s12 = smov 94   ;;  %s850_s28 = smov 96  }
  0x2a   : > { %v250_v2 = vunpack.c.l.b16 %v245_v0  ;;  %v248_v3 = vunpack.c.l.b16 %v244_v1  ;;  %v249_v4 = vunpack.c.h.b16 %v244_v1  ;;  %s851_s13 = smov 95   ;;  %s852_s15 = smov 111   ;;  %vm326_vm0 = vcmask 1043456   ;;  %v376_v37 = vld [vmem:[%s1185_s2] sm:$0xff] }
  0x2b   : > { %s853_s16 = smov 110   ;;  %s854_s17 = smov 126   ;;  %vm323_vm1 = vcmask 769024   ;;  %vm305_vm2 = vcmask 785408   ;;  %vm314_vm3 = vcmask 777216   ;;  %vm287_vm4 = vcmask 908288  }
  0x2c   : > { %v972_v5 = vpack.c.b16 %v250_v2, %v250_v2  ;;  %v974_v6 = vpack.c.b16 %v248_v3, %v248_v3  ;;  %v976_v7 = vpack.c.b16 %v249_v4, %v249_v4  ;;  %s855_s23 = smov 112   ;;  %s856_s25 = smov 127   ;;  %vm296_vm5 = vcmask 900096   ;;  %v375_v49 = vld [vmem:[%s1184_s1] sm:$0xf] }
  0x2d   : > { %v857_v38 = vmov 0   ;;  %vm382_vm6 = vcmask 588800   ;;  %vm269_vm7 = vcmask 1031168   ;;  %vm278_vm8 = vcmask 916480   ;;  %s588_s7 = scalar_lea.sflag [#allocation4], %s964_s6  ;;  %s801_s11 = scalar_lea.hbm %s1188_s5, 32 }
  0x2e   : > { %321 = vrot.lane.b32.xlu1 %v972_v5, %s849_s12  ;;  %317 = vrot.lane.b32.xlu0 %v974_v6, %s849_s12  ;;  %vm260_vm9 = vcmask 1039360  }
  0x2f   : > { %301 = vrot.lane.b32.xlu2 %v976_v7, %s850_s28  ;;  %749 = vset.pattern.permute.xlu0 %v857_v38 }
  0x30   : > { %750 = vset.pattern.permute.xlu2 %v857_v38 }
  0x36   : > { %299 = vrot.lane.b32.xlu1 %v974_v6, %s850_s28  ;;  %319 = vrot.lane.b32.xlu0 %v976_v7, %s849_s12 }
  0x37   : > { %303 = vrot.lane.b32.xlu2 %v972_v5, %s850_s28 }
  0x3e   : > { %310 = vrot.lane.b32.xlu1 %v976_v7, %s851_s13  ;;  %308 = vrot.lane.b32.xlu0 %v974_v6, %s851_s13 }
  0x3f   : > { %312 = vrot.lane.b32.xlu2 %v972_v5, %s851_s13 }
  0x46   : > { %283 = vrot.lane.b32.xlu1 %v976_v7, %s852_s15  ;;  %281 = vrot.lane.b32.xlu0 %v974_v6, %s852_s15 }
  0x47   : > { %285 = vrot.lane.b32.xlu2 %v972_v5, %s852_s15 }
  0x4e   : > { %292 = vrot.lane.b32.xlu1 %v976_v7, %s853_s16  ;;  %290 = vrot.lane.b32.xlu0 %v974_v6, %s853_s16 }
  0x4f   : > { %294 = vrot.lane.b32.xlu2 %v972_v5, %s853_s16 }
  0x56   : > { %265 = vrot.lane.b32.xlu1 %v976_v7, %s854_s17  ;;  %263 = vrot.lane.b32.xlu0 %v974_v6, %s854_s17 }
  0x57   : > { %267 = vrot.lane.b32.xlu2 %v972_v5, %s854_s17 }
  0x5e   : > { %274 = vrot.lane.b32.xlu1 %v976_v7, %s855_s23  ;;  %272 = vrot.lane.b32.xlu0 %v974_v6, %s855_s23 }
  0x5f   : > { %276 = vrot.lane.b32.xlu2 %v972_v5, %s855_s23 }
  0x66   : > { %256 = vrot.lane.b32.xlu1 %v976_v7, %s856_s25  ;;  %254 = vrot.lane.b32.xlu0 %v974_v6, %s856_s25 }
  0x67   : > { %258 = vrot.lane.b32.xlu2 %v972_v5, %s856_s25 }
  0x6e   : > { %379 = vperm.xlu0 %749, %v376_v37  }
  0x89   : > { %v302_v8 = vpop.permute.xlu2 %301 }
  0x91   : > { %v304_v9 = vpop.permute.xlu2 %303 }
  0x92   : > { %v307_v26 = vsel %vm305_vm2, %v302_v8, %v304_v9 }
  0x99   : > { %v313_v10 = vpop.permute.xlu2 %312 }
  0x9a   : > { %v373_v15 = vsel %vm326_vm0, %v304_v9, %v313_v10 }
  0xa0   : > { %v322_v11 = vpop.permute.xlu1 %321  ;;  %v318_v12 = vpop.permute.xlu0 %317 }
  0xa1   : > { %v393_v13 = vsel %vm326_vm0, %v322_v11, 0  ;;  %v286_v14 = vpop.permute.xlu2 %285 }
  0xa2   : > { %424 = vmatpush.bf16.msra.mxu2 %v393_v13 }
  0xa6   : > { %425 = vmatpush.bf16.msra.mxu2 %v373_v15 }
  0xa8   : > { %v300_v16 = vpop.permute.xlu1 %299  ;;  %v320_v17 = vpop.permute.xlu0 %319 }
  0xa9   : > { %v324_v18 = vsel %vm323_vm1, %v318_v12, %v320_v17  ;;  %v325_v19 = vsel %vm323_vm1, %v320_v17, %v322_v11  ;;  %v295_v20 = vpop.permute.xlu2 %294  ;;  %v306_v27 = vsel %vm305_vm2, %v300_v16, %v302_v8 }
  0xaa   : > { %v387_v21 = vsel %vm326_vm0, %v324_v18, 0  ;;  %v390_v22 = vsel %vm326_vm0, %v325_v19, 0  ;;  %v361_v23 = vsel %vm326_vm0, %v286_v14, %v295_v20 }
  0xab   : > { %398 = vmatpush.bf16.msra.mxu0 %v387_v21  ;;  %411 = vmatpush.bf16.msra.mxu1 %v390_v22 }
  0xac   : > { %426 = vmatpush.bf16.msra.mxu2 %v361_v23 }
  0xb0   : > { %v311_v24 = vpop.permute.xlu1 %310  ;;  %v309_v25 = vpop.permute.xlu0 %308 }
  0xb1   : > { %v316_v28 = vsel %vm314_vm3, %v311_v24, %v313_v10  ;;  %v315_v29 = vsel %vm314_vm3, %v309_v25, %v311_v24  ;;  %v268_v30 = vpop.permute.xlu2 %267 }
  0xb2   : > { %v365_v31 = vsel %vm326_vm0, %v306_v27, %v315_v29  ;;  %v369_v32 = vsel %vm326_vm0, %v307_v26, %v316_v28 }
  0xb3   : > { %399 = vmatpush.bf16.msra.mxu0 %v365_v31  ;;  %412 = vmatpush.bf16.msra.mxu1 %v369_v32 }
  0xb8   : > { %v284_v33 = vpop.permute.xlu1 %283  ;;  %v282_v34 = vpop.permute.xlu0 %281 }
  0xb9   : > { %v277_v35 = vpop.permute.xlu2 %276  ;;  %v289_v41 = vsel %vm287_vm4, %v284_v33, %v286_v14  ;;  %v288_v42 = vsel %vm287_vm4, %v282_v34, %v284_v33 }
  0xba   : > { %v349_v36 = vsel %vm326_vm0, %v268_v30, %v277_v35 }
  0xbb   : > { %427 = vmatpush.bf16.msra.mxu2 %v349_v36 }
  0xc0   : > { %v293_v39 = vpop.permute.xlu1 %292  ;;  %v291_v40 = vpop.permute.xlu0 %290 }
  0xc1   : > { %v298_v43 = vsel %vm296_vm5, %v293_v39, %v295_v20  ;;  %v297_v44 = vsel %vm296_vm5, %v291_v40, %v293_v39  ;;  %v259_v45 = vpop.permute.xlu2 %258 }
  0xc2   : > { %v353_v46 = vsel %vm326_vm0, %v288_v42, %v297_v44  ;;  %v357_v47 = vsel %vm326_vm0, %v289_v41, %v298_v43  ;;  %v337_v48 = vsel %vm326_vm0, %v972_v5, %v259_v45 }
  0xc3   : > { %400 = vmatpush.bf16.msra.mxu0 %v353_v46  ;;  %413 = vmatpush.bf16.msra.mxu1 %v357_v47 }
  0xc4   : > { %428 = vmatpush.bf16.msra.mxu2 %v337_v48 }
  0xc7   : > { %682 = vmatmul.msk.bf16.vlgmr.msra.gmra.mxu2 %vm382_vm6, %v375_v49 }
  0xc8   : > { %v266_v50 = vpop.permute.xlu1 %265  ;;  %v264_v51 = vpop.permute.xlu0 %263 }
  0xc9   : > { %v271_v54 = vsel %vm269_vm7, %v266_v50, %v268_v30  ;;  %v270_v55 = vsel %vm269_vm7, %v264_v51, %v266_v50 }
  0xd0   : > { %v275_v52 = vpop.permute.xlu1 %274  ;;  %v273_v53 = vpop.permute.xlu0 %272 }
  0xd1   : > { %v280_v56 = vsel %vm278_vm8, %v275_v52, %v277_v35  ;;  %v279_v57 = vsel %vm278_vm8, %v273_v53, %v275_v52  ;;  %v544_v52 = vld [vmem:[%s1187_s4] sm:$0xff] }
  0xd2   : > { %v341_v58 = vsel %vm326_vm0, %v270_v55, %v279_v57  ;;  %v345_v59 = vsel %vm326_vm0, %v271_v54, %v280_v56  ;;  %v543_v57 = vld [vmem:[%s1186_s3] sm:$0xf] }
  0xd3   : > { %401 = vmatpush.bf16.msra.mxu0 %v341_v58  ;;  %414 = vmatpush.bf16.msra.mxu1 %v345_v59 }
  0xd8   : > { %v257_v60 = vpop.permute.xlu1 %256  ;;  %v255_v61 = vpop.permute.xlu0 %254 }
  0xd9   : > { %v262_v62 = vsel %vm260_vm9, %v257_v60, %v259_v45  ;;  %v261_v63 = vsel %vm260_vm9, %v255_v61, %v257_v60 }
  0xda   : > { %v329_v0 = vsel %vm326_vm0, %v974_v6, %v261_v63  ;;  %v333_v1 = vsel %vm326_vm0, %v976_v7, %v262_v62 }
  0xdb   : > { %402 = vmatpush.bf16.msra.mxu0 %v329_v0  ;;  %415 = vmatpush.bf16.msra.mxu1 %v333_v1 }
  0xde   : > { %680 = vmatmul.msk.bf16.vlgmr.msra.gmra.mxu0 %vm382_vm6, %v375_v49  ;;  %681 = vmatmul.msk.bf16.vlgmr.msra.gmra.mxu1 %vm382_vm6, %v375_v49 }
  0xe0   : > { %v380_v4 = vpop.permute.xlu0 %379 }
 0x14a   : > { %v430_v2 = vpop.f32.mrf.mxu2 }
 0x14b   : > { %v431_v18 = vadd.f32 %v430_v2, %v380_v4 }
 0x14d   : > { %v436_v19 = vmax.f32 %v431_v18, 0.0 }
 0x14f   : > { %v438_v20 = vpack.c.bf16 %v436_v19, %v436_v19 }
 0x151   : > { %v445_v21 = vunpack.c.l.b16 %v438_v20 }
 0x152   : > { %v432_v3 = vpop.f32.mrf.mxu2 }
 0x153   : > { %v446_v22 = vpack.c.b16 %v445_v21, %v445_v21 }
 0x15b   : > { %v404_v5 = vpop.f32.mrf.mxu0  ;;  %v417_v8 = vpop.f32.mrf.mxu1 }
 0x15c   : > { %v405_v9 = vadd.f32 %v404_v5, %v380_v4  ;;  %v418_v10 = vadd.f32 %v417_v8, %v380_v4 }
 0x15e   : > { %v434_v11 = vmax.f32 %v405_v9, 0.0  ;;  %v435_v12 = vmax.f32 %v418_v10, 0.0 }
 0x160   : > { %v437_v13 = vpack.c.bf16 %v435_v12, %v434_v11 }
 0x162   : > { %v440_v6 = vunpack.c.l.b16 %v437_v13  ;;  %v441_v14 = vunpack.c.h.b16 %v437_v13 }
 0x163   : > { %v406_v15 = vpop.f32.mrf.mxu0  ;;  %v419_v7 = vpop.f32.mrf.mxu1 }
 0x164   : > { %v1069_v16 = vpack.c.b16 %v440_v6, %v440_v6  ;;  %v1071_v17 = vpack.c.b16 %v441_v14, %v441_v14 }
 0x166   : > { %505 = vrot.lane.b32.xlu2 %v1071_v17, %s849_s12  ;;  %495 = vrot.lane.b32.xlu0 %v1069_v16, %s851_s13 }
 0x167   : > { %503 = vrot.lane.b32.xlu1 %v1069_v16, %s849_s12 }
 0x16e   : > { %489 = vrot.lane.b32.xlu2 %v1071_v17, %s850_s28  ;;  %471 = vrot.lane.b32.xlu0 %v1069_v16, %s852_s15 }
 0x16f   : > { %487 = vrot.lane.b32.xlu1 %v1069_v16, %s850_s28 }
 0x176   : > { %479 = vrot.lane.b32.xlu2 %v1069_v16, %s853_s16  ;;  %481 = vrot.lane.b32.xlu0 %v1071_v17, %s853_s16 }
 0x177   : > { %497 = vrot.lane.b32.xlu1 %v1071_v17, %s851_s13 }
 0x17e   : > { %463 = vrot.lane.b32.xlu2 %v1069_v16, %s855_s23  ;;  %455 = vrot.lane.b32.xlu0 %v1069_v16, %s854_s17 }
 0x17f   : > { %473 = vrot.lane.b32.xlu1 %v1071_v17, %s852_s15 }
 0x186   : > { %507 = vrot.lane.b32.xlu2 %v446_v22, %s849_s12  ;;  %465 = vrot.lane.b32.xlu0 %v1071_v17, %s855_s23 }
 0x187   : > { %457 = vrot.lane.b32.xlu1 %v1071_v17, %s854_s17 }
 0x18e   : > { %499 = vrot.lane.b32.xlu2 %v446_v22, %s851_s13  ;;  %447 = vrot.lane.b32.xlu0 %v1069_v16, %s856_s25 }
 0x18f   : > { %449 = vrot.lane.b32.xlu1 %v1071_v17, %s856_s25 }
 0x196   : > { %483 = vrot.lane.b32.xlu2 %v446_v22, %s853_s16  ;;  %467 = vrot.lane.b32.xlu0 %v446_v22, %s855_s23 }
 0x197   : > { %491 = vrot.lane.b32.xlu1 %v446_v22, %s850_s28  ;;  %s679_s28 = sshll.u32 %s964_s6, 4 }
 0x198   : > { %s242_s13 = scalar_lea.vmem [#allocation5], %s679_s28 }
 0x19e   : > { %459 = vrot.lane.b32.xlu2 %v446_v22, %s854_s17 }
 0x19f   : > { %475 = vrot.lane.b32.xlu1 %v446_v22, %s852_s15  ;;  %s690_s15 = sshll.u32 %s909_s22, 4 }
 0x1a0   : > { %s599_s23 = scalar_lea.hbm %s1188_s5, %s690_s15 }
 0x1a1   : > { %s603_s26 = sshll.u32 %s599_s23, 4  ;;  %s604_s26 = int_to_ptr.hbm [resolvable:$true] %s603_s26 }
 0x1a2   : > { %s795_s9 = sshra.s32 %s604_s26, 4  ;;  %s796_s9 = int_to_ptr.hbm [resolvable:$true] %s795_s9 }
 0x1a3   : > { %s797_s10 = scalar_lea.hbm %s796_s9, 16  ;;  %p802_p3 = scmp.lt.s32.totalorder %s796_s9, %s1188_s5 }
 0x1a4   : > { %p798_p6 = scmp.ne.s32.totalorder %s796_s9, %s797_s10  ;;  %p803_p4 = scmp.lt.s32.totalorder %s801_s11, %s797_s10 }
 0x1a6   : > { %547 = vperm.xlu2 %750, %v544_v52   ;;  %p799_p13 = pnand %p798_p6, %p934_p11  ;;  %p804_p5 = por %p803_p4, %p802_p3 }
 0x1a7   : > { %451 = vrot.lane.b32.xlu1 %v446_v22, %s856_s25  ;;  %s601_s25 = sshll.u32 %s242_s13, 4  ;;  %s602_s25 = int_to_ptr.vmem [resolvable:$true] %s601_s25 }
 0x1a8   : > { %p800_p2 = pneg %p799_p13 }
 0x1aa   : > { %p805_p7 = pnand %p804_p5, %p800_p2 }
 0x1c0   : > { %v506_v23 = vpop.permute.xlu2 %505 }
 0x1c8   : > { %v490_v24 = vpop.permute.xlu2 %489 }
 0x1d0   : > { %v480_v25 = vpop.permute.xlu2 %479 }
 0x1d8   : > { %v464_v26 = vpop.permute.xlu2 %463  ;;  %v496_v27 = vpop.permute.xlu0 %495 }
 0x1d9   : > { %v504_v28 = vpop.permute.xlu1 %503 }
 0x1da   : > { %v509_v29 = vsel %vm323_vm1, %v504_v28, %v506_v23 }
 0x1db   : > { %v554_v30 = vsel %vm326_vm0, %v509_v29, 0 }
 0x1dc   : > { %562 = vmatpush.bf16.msra.mxu3 %v554_v30 }
 0x1e0   : > { %v508_v31 = vpop.permute.xlu2 %507  ;;  %v472_v32 = vpop.permute.xlu0 %471 }
 0x1e1   : > { %v488_v33 = vpop.permute.xlu1 %487  ;;  %v510_v34 = vsel %vm323_vm1, %v506_v23, %v508_v31 }
 0x1e2   : > { %v557_v35 = vsel %vm326_vm0, %v510_v34, 0  ;;  %v493_v38 = vsel %vm305_vm2, %v488_v33, %v490_v24 }
 0x1e3   : > { %575 = vmatpush.bf16.msrb.mxu0 %v557_v35 }
 0x1e8   : > { %v482_v36 = vpop.permute.xlu0 %481  ;;  %v500_v51 = vpop.permute.xlu2 %499 }
 0x1e9   : > { %v498_v37 = vpop.permute.xlu1 %497  ;;  %v485_v43 = vsel %vm296_vm5, %v480_v25, %v482_v36 }
 0x1ea   : > { %v501_v39 = vsel %vm314_vm3, %v496_v27, %v498_v37  ;;  %v502_v60 = vsel %vm314_vm3, %v498_v37, %v500_v51 }
 0x1eb   : > { %v537_v40 = vsel %vm326_vm0, %v493_v38, %v501_v39 }
 0x1ec   : > { %563 = vmatpush.bf16.msra.mxu3 %v537_v40 }
 0x1f0   : > { %v456_v41 = vpop.permute.xlu0 %455  ;;  %v484_v58 = vpop.permute.xlu2 %483 }
 0x1f1   : > { %v474_v42 = vpop.permute.xlu1 %473  ;;  %v486_v1 = vsel %vm296_vm5, %v482_v36, %v484_v58 }
 0x1f2   : > { %v477_v44 = vsel %vm287_vm4, %v472_v32, %v474_v42 }
 0x1f3   : > { %v529_v45 = vsel %vm326_vm0, %v477_v44, %v485_v43 }
 0x1f4   : > { %564 = vmatpush.bf16.msra.mxu3 %v529_v45 }
 0x1f8   : > { %v466_v46 = vpop.permute.xlu0 %465  ;;  %v460_v3 = vpop.permute.xlu2 %459 }
 0x1f9   : > { %v469_v47 = vsel %vm278_vm8, %v464_v26, %v466_v46  ;;  %v458_v48 = vpop.permute.xlu1 %457 }
 0x1fa   : > { %v461_v49 = vsel %vm269_vm7, %v456_v41, %v458_v48  ;;  %v462_v8 = vsel %vm269_vm7, %v458_v48, %v460_v3 }
 0x1fb   : > { %v521_v50 = vsel %vm326_vm0, %v461_v49, %v469_v47 }
 0x1fc   : > { %565 = vmatpush.bf16.msra.mxu3 %v521_v50 }
 0x200   : > { %v448_v53 = vpop.permute.xlu0 %447  ;;  %v548_v13 = vpop.permute.xlu2 %547 }
 0x201   : > { %v450_v54 = vpop.permute.xlu1 %449 }
 0x202   : > { %v453_v55 = vsel %vm260_vm9, %v448_v53, %v450_v54 }
 0x203   : > { %v513_v56 = vsel %vm326_vm0, %v1069_v16, %v453_v55 }
 0x204   : > { %566 = vmatpush.bf16.msra.mxu3 %v513_v56 }
 0x207   : > { %683 = vmatmul.msk.bf16.vlgmr.msra.gmra.mxu3 %vm382_vm6, %v543_v57 }
 0x208   : > { %v468_v63 = vpop.permute.xlu0 %467 }
 0x209   : > { %v492_v59 = vpop.permute.xlu1 %491  ;;  %v470_v5 = vsel %vm278_vm8, %v466_v46, %v468_v63 }
 0x20a   : > { %v494_v61 = vsel %vm305_vm2, %v490_v24, %v492_v59  ;;  %v525_v9 = vsel %vm326_vm0, %v462_v8, %v470_v5 }
 0x20b   : > { %v541_v62 = vsel %vm326_vm0, %v494_v61, %v502_v60 }
 0x20c   : > { %576 = vmatpush.bf16.msrb.mxu0 %v541_v62 }
 0x211   : > { %v476_v0 = vpop.permute.xlu1 %475 }
 0x212   : > { %v478_v2 = vsel %vm287_vm4, %v474_v42, %v476_v0 }
 0x213   : > { %v533_v4 = vsel %vm326_vm0, %v478_v2, %v486_v1 }
 0x214   : > { %577 = vmatpush.bf16.msrb.mxu0 %v533_v4 }
 0x218   : > { %578 = vmatpush.bf16.msrb.mxu0 %v525_v9 }
 0x219   : > { %v452_v10 = vpop.permute.xlu1 %451 }
 0x21a   : > { %v454_v11 = vsel %vm260_vm9, %v450_v54, %v452_v10 }
 0x21b   : > { %v517_v12 = vsel %vm326_vm0, %v1071_v17, %v454_v11 }
 0x21c   : > { %579 = vmatpush.bf16.msrb.mxu0 %v517_v12 }
 0x21f   : > { %684 = vmatmul.msk.bf16.vlgmr.msrb.gmra.mxu0 %vm382_vm6, %v543_v57 }
 0x28a   : > { %v568_v6 = vpop.f32.mrf.mxu3 }
 0x28b   : > { %v569_v14 = vadd.f32 %v568_v6, %v548_v13 }
 0x28d   : > { %585 = vst [vmem:[%s242_s13] sm:$0xff] %v569_v14 }
 0x292   : > { %v570_v15 = vpop.f32.mrf.mxu3 }
 0x29c   : > { %v581_v7 = vpop.f32.mrf.mxu0 }
 0x29d   : > { %v582_v16 = vadd.f32 %v581_v7, %v548_v13 }
 0x29f   : > { %586 = vst [vmem:[%s242_s13 + $0x8] sm:$0xff] %v582_v16 }
 0x2a0   : > { %808 = shalt.err (!%p805_p7)
}
 0x2a1   : > { %696 = dma.vmem_to_hbm [thread:$0]  (%p934_p11), %s602_s25, 256, %s604_s26, %s588_s7  }
 0x2a4   : > { %v583_v17 = vpop.f32.mrf.mxu0 }
 0x2a5 PF: > { %s615_s6 = sand.u32 1, %s835_s18   ;;  %p703_p8 = pnand %p676_p9, %p938_p12 }
 0x2a6   : > { %s616_s28 = scalar_lea.sflag [#allocation4], %s615_s6 }
 0x2a7   : > { %p704_p10 = pneg %p703_p8 }
 0x2a9   : > { %830 = dma.done.wait (%p704_p10), %s616_s28, 256  }
 0x2aa   : > { %832 = vsyncadd (%p704_p10), %s616_s28, 4294967040  ;;  %p18_p0 = scmp.ge.s32.totalorder %s913_s24, 4   ;;  %s1193_s18 = smov %s839_s19 }
 0x2ab   : > { %s1194_s19 = smov %s843_s20  ;;  %s1195_s20 = smov %s925_s27 }
 0x2ac   : > { %s1196_s21 = smov %s913_s24  ;;  %20 = sbr.rel (!%p18_p0) target bundleno = 5 (0x5), region = 85 }
 0x2b1   :  { %622 = vsyncpa [#allocation3], 1 }
 0x2b2   :  { %624 = vsyncpa [#allocation3 + $0x1], 1 }
 0x2b3   :  { %625 = vsyncpa [#allocation4], 1 }
 0x2b4   :  { %627 = vsyncpa [#allocation4 + $0x1], 1 }

</bundles_post_ra>
